<compile_context>
chip_gen: v5e
topology: v5e:2x2
jax: 0.10.0
libtpu: 0.0.40
codegen_flags: <defaults>
</compile_context>

<pallas_src>
import functools

import jax
import jax.numpy as jnp
import numpy as np
from jax.experimental import pallas as pl
from jax.experimental.pallas import tpu as pltpu


def _pixel_shuffle_1d_kernel(x_ref, o_ref):
    # x_ref: (1, r, tC, tW)   o_ref: (1, tC, tW * r)
    x = x_ref[0]                        # (r, tC, tW)
    r, tc, tw = x.shape
    # y[c, w, u] = x[u, c, w]  ->  merge (w, u) into the lane dim.
    y = jnp.transpose(x, (1, 2, 0))     # (tC, tW, r)
    o_ref[0] = y.reshape(tc, tw * r)


def _pick_tile_w(w, r, tc_unit, itemsize, target_bytes):
    """Largest multiple-of-128 divisor of W that fits the byte budget, else W."""
    if w % 128 != 0:
        # Any divisor of W that is a multiple of 128 requires 128 | W,
        # so fall back to the full-dim exception.
        return w
    for k in range(w // 128, 0, -1):
        cand = 128 * k
        if w % cand == 0 and r * tc_unit * cand * itemsize <= target_bytes:
            return cand
    return 128  # stay lane-dense even if slightly over budget


def _pick_tile_c(c_long, r, sublane, tw, itemsize, target_bytes):
    """Largest sublane-multiple divisor of C_long that fits the budget, else C_long."""
    if c_long % sublane != 0:
        return c_long  # full-dim exception (also covers c_long < sublane)
    for k in range(c_long // sublane, 0, -1):
        cand = sublane * k
        if c_long % cand == 0 and r * cand * tw * itemsize <= target_bytes:
            return cand
    return sublane


def pixel_shuffle_1d(x, upscale_factor, *, target_tile_bytes=2 * 1024 * 1024):
    b, c_short, w = x.shape
    r = int(upscale_factor)
    assert c_short % r == 0, "channels must be divisible by upscale_factor"
    c_long = c_short // r
    w_long = w * r

    itemsize = jnp.dtype(x.dtype).itemsize
    sublane = max(8, 32 // itemsize)          # 8 f32 / 16 bf16 / 32 int8

    tc_unit = sublane if (c_long % sublane == 0) else c_long
    tw = _pick_tile_w(w, r, tc_unit, itemsize, target_tile_bytes)
    tc = _pick_tile_c(c_long, r, sublane, tw, itemsize, target_tile_bytes)

    # Free contiguous view: channel index = u * c_long + c  ->  x4[b, u, c, w].
    x4 = x.reshape(b, r, c_long, w)

    grid = (b, c_long // tc, w // tw)

    cost = pl.CostEstimate(
        flops=0,
        transcendentals=0,
        bytes_accessed=2 * b * c_short * w * itemsize,  # read once + write once
    )

    return pl.pallas_call(
        _pixel_shuffle_1d_kernel,
        out_shape=jax.ShapeDtypeStruct((b, c_long, w_long), x.dtype),
        grid_spec=pltpu.PrefetchScalarGridSpec(
            num_scalar_prefetch=0,
            grid=grid,
            in_specs=[
                pl.BlockSpec((1, r, tc, tw), lambda bi, ci, wi: (bi, 0, ci, wi)),
            ],
            out_specs=pl.BlockSpec((1, tc, tw * r), lambda bi, ci, wi: (bi, ci, wi)),
        ),
        compiler_params=pltpu.CompilerParams(
            dimension_semantics=("parallel", "parallel", "parallel"),
        ),
        cost_estimate=cost,
    )(x4)


def _reference(x, r):
    # Pure-JAX mirror of the PyTorch forward, used only to validate the kernel.
    b, c_short, w = x.shape
    c_long = c_short // r
    y = x.reshape(b, r, c_long, w)
    y = jnp.transpose(y, (0, 2, 3, 1))
    return y.reshape(b, c_long, w * r)


if __name__ == "__main__":
    key = jax.random.PRNGKey(0)
    k1, k2 = jax.random.split(key)

    # Case 1: small shape consistent with the module (full-dim blocks, grid=(B,1,1)).
    B, C_SHORT, W_SHORT, R = 2, 8, 16, 4          # -> output (2, 2, 64)
    x = jax.random.normal(k1, (B, C_SHORT, W_SHORT), dtype=jnp.float32)
    out = jax.block_until_ready(pixel_shuffle_1d(x, R))
    ref = _reference(x, R)
    np.testing.assert_allclose(np.asarray(out), np.asarray(ref), rtol=0, atol=0)
    assert out.shape == (B, C_SHORT // R, W_SHORT * R)
    assert out.dtype == x.dtype

    # Case 2: exercises the tiled path (forced small budget -> grid=(1, 4, 2),
    # tC=8, tW=256, lane-dense 512-wide output tiles) including B==1.
    B2, C2, W2, R2 = 1, 64, 512, 2                # -> output (1, 32, 1024)
    x2 = jax.random.normal(k2, (B2, C2, W2), dtype=jnp.float32)
    out2 = jax.block_until_ready(
        pixel_shuffle_1d(x2, R2, target_tile_bytes=16 * 1024))
    ref2 = _reference(x2, R2)
    np.testing.assert_allclose(np.asarray(out2), np.asarray(ref2), rtol=0, atol=0)
    assert out2.shape == (B2, C2 // R2, W2 * R2)
    assert out2.dtype == x2.dtype

    print("KERNEL_OK")
</pallas_src>

<mosaic_0001>
module attributes {stable_mosaic.version = 11 : i64} {
  func.func @_pixel_shuffle_1d_kernel(%arg0: i32, %arg1: i32, %arg2: i32, %arg3: memref<1x4x2x16xf32, #tpu.memory_space<vmem>>, %arg4: memref<1x2x64xf32, #tpu.memory_space<vmem>>) attributes {dimension_semantics = [#tpu.dimension_semantics<parallel>, #tpu.dimension_semantics<parallel>, #tpu.dimension_semantics<parallel>], iteration_bounds = array<i64: 2, 1, 1>, scalar_prefetch = 0 : i64, scratch_operands = 0 : i64, tpu.core_type = #tpu.core_type<tc>, window_params = [{transform_indices = @transform_0, window_bounds = array<i64: 1, 4, 2, 16>}, {transform_indices = @transform_1, window_bounds = array<i64: 1, 2, 64>}]} {
    %c0 = arith.constant 0 : index
    %c0_0 = arith.constant 0 : index
    %c0_1 = arith.constant 0 : index
    %c0_2 = arith.constant 0 : index
    %0 = vector.load %arg3[%c0, %c0_0, %c0_1, %c0_2] : memref<1x4x2x16xf32, #tpu.memory_space<vmem>>, vector<1x4x2x16xf32>
    %1 = vector.shape_cast %0 : vector<1x4x2x16xf32> to vector<4x2x16xf32>
    %2 = tpu.transpose %1, [1, 2, 0] : vector<4x2x16xf32> -> vector<2x16x4xf32>
    %3 = vector.shape_cast %2 : vector<2x16x4xf32> to vector<2x64xf32>
    %c0_3 = arith.constant 0 : index
    %c0_4 = arith.constant 0 : index
    %c0_5 = arith.constant 0 : index
    %4 = vector.load %arg4[%c0_3, %c0_4, %c0_5] : memref<1x2x64xf32, #tpu.memory_space<vmem>>, vector<1x2x64xf32>
    %5 = vector.shape_cast %4 : vector<1x2x64xf32> to vector<2x64xf32>
    %6 = vector.shape_cast %3 : vector<2x64xf32> to vector<1x2x64xf32>
    tpu.vector_store %arg4[%c0_3, %c0_4, %c0_5], %6 {strides = array<i32>} : memref<1x2x64xf32, #tpu.memory_space<vmem>>, vector<1x2x64xf32>,
    return
  }
  func.func @transform_0(%arg0: i32, %arg1: i32, %arg2: i32) -> (i32, i32, i32, i32) {
    %c0_i32 = arith.constant 0 : i32
    %c0_i32_0 = arith.constant 0 : i32
    return %arg0, %c0_i32, %arg1, %arg2 : i32, i32, i32, i32
  }
  func.func @transform_1(%arg0: i32, %arg1: i32, %arg2: i32) -> (i32, i32, i32) {
    %c0_i32 = arith.constant 0 : i32
    return %arg0, %arg1, %arg2 : i32, i32, i32
  }
}

</mosaic_0001>

<bundles_post_ra>
// kernel: tpu_custom_call.1
= control target key start
LH: loop header
LB: loop body
LE: loop exit
PB: predicated region body
PF: predicated region fallthrough
CT: control target
= control target key end

     0   :  { %6 = vsyncpa [#allocation3], 0  ;;  %s1776_s0 = inlined_call_operand.hbm [shape: f32[2,4,2,16], index: 0, kind: input, shape index: {}]   ;;  %s1777_s1 = inlined_call_operand.hbm [shape: f32[2,2,64], index: 1, kind: output, shape index: {}]  }
   0x1   :  { %8 = vsyncpa [#allocation3 + $0x1], 0 }
   0x2   :  { %9 = vsyncpa [#allocation4], 0 }
   0x3   :  { %11 = vsyncpa [#allocation4 + $0x1], 0  ;;  %s1543_s6 = smov 0   ;;  %s1545_s7 = smov 0  }
   0x4   :  { %s1547_s8 = smov 0   ;;  %s1549_s9 = smov 0  }
   0x5   :  { %s1551_s10 = smov 0   ;;  %s1553_s11 = smov 0  }
   0x6 LB: > { %s1303_s12 = sadd.s32 4294967295, %s1512_s11   ;;  %s1304_s13 = sadd.s32 4294967294, %s1512_s11   ;;  %s1512_s11 = sphi %s1553_s11, %s17_s11   ;;  %s1508_s10 = sphi %s1551_s10, %s1786_s10   ;;  %s1504_s9 = sphi %s1549_s9, %s1785_s9   ;;  %s1500_s8 = sphi %s1547_s8, %s1784_s8   ;;  %s1496_s7 = sphi %s1545_s7, %s1783_s7   ;;  %s1492_s6 = sphi %s1543_s6, %s1782_s6  }
   0x7   : > { %s36_s14 = sadd.s32 1, %s1508_s10  ;;  %s47_s15 = sadd.s32 1, %s1500_s8 }
   0x8   : > { %p38_p0 = scmp.ge.s32.totalorder %s36_s14, 2  ;;  %p54_p1 = scmp.ne.s32.totalorder %s1500_s8, %s1496_s7 }
   0x9   : > { %p55_p2 = scmp.eq.s32.totalorder %s1512_s11, 0  ;;  %p60_p3 = scmp.ne.s32.totalorder %s1496_s7, %s1492_s6 }
   0xa   : > { %s1788_s14 = smov (%p38_p0, %s36_s14), 0  ;;  %p61_p5 = scmp.eq.s32.totalorder %s1303_s12, 0 }
   0xb   : > { %p1584_p4 = por %p55_p2, %p54_p1  ;;  %s40_s17 = ssub.s32 %s1508_s10, %s1788_s14 }
   0xc   : > { %p88_p6 = scmp.eq.s32.totalorder %s1303_s12, 1  ;;  %p45_p7 = scmp.eq.s32.totalorder %s40_s17, 0 }
   0xd   : > { %p1590_p8 = por %p61_p5, %p60_p3  ;;  %p94_p10 = scmp.eq.s32.totalorder %s1304_s13, 1 }
   0xe   : > { %p1594_p9 = por %p88_p6, %p54_p1  ;;  %p1306_p12 = scmp.ge.s32.totalorder %s1512_s11, 2 }
   0xf   : > { %s1599_s20 = scalar_select %p45_p7, %s1500_s8, %s47_s15  }
  0x10   : > { %p1601_p11 = por %p94_p10, %p60_p3  ;;  %p1330_p13 = scmp.lt.s32.totalorder %s1512_s11, 2 }
  0x11   : > { %s114_s22 = sand.u32 1, %s1500_s8   ;;  %s1317_s24 = sshll.u32 %s1508_s10, 3 }
  0x12   : > { %s1307_s23 = sshll.u32 %s114_s22, 3  ;;  %s125_s27 = scalar_lea.hbm %s1776_s0, %s1317_s24 }
  0x13   : > { %s118_s28 = scalar_lea.vmem [#allocation2], %s1307_s23  ;;  %s126_s30 = sshll.u32 %s125_s27, 4  ;;  %s127_s30 = int_to_ptr.hbm [resolvable:$true] %s126_s30 }
  0x14   : > { %s128_s29 = sshll.u32 %s118_s28, 4  ;;  %p1323_p0 = pnand %p1330_p13, %p1584_p4  ;;  %s129_s29 = int_to_ptr.vmem [resolvable:$true] %s128_s29 }
  0x15   : > { %p1310_p1 = scmp.ge.s32.totalorder %s1512_s11, 1  ;;  %s115_s2 = scalar_lea.sflag [#allocation3], %s114_s22 }
  0x16   : > { %s1514_s3 = smov 32   ;;  %s1515_s4 = smov 2  }
  0x17   : > { %1325 = dma.hbm_to_vmem [thread:$0]  (!%p1323_p0), %s127_s30, 128, %s129_s29, %s115_s2, %s1514_s3, %s1514_s3, %s1515_s4  }
  0x18   : > { %p136_p2 = scmp.lt.s32.totalorder %s1512_s11, 3 }
  0x1a   : > { %p137_p3 = pnand %p1310_p1, %p136_p2 }
  0x1b   : > { %s1617_s5 = sand.u32 (!%p137_p3), 1, %s1496_s7  }
  0x1c   : > { %140 = sbr.rel (%p137_p3) target bundleno = 591 (0x24f), region = 24  ;;  %s1311_s12 = sshll.u32 (!%p137_p3), %s1617_s5, 3 }
  0x1d   : > { %s143_s13 = scalar_lea.sflag (!%p137_p3), [#allocation3], %s1617_s5  ;;  %s146_s15 = scalar_lea.vmem (!%p137_p3), [#allocation2], %s1311_s12 }
  0x21   : > { %1483 = dma.done.wait (%p1590_p8), %s143_s13, 128  }
  0x22   : > { %1485 = vsyncadd (%p1590_p8), %s143_s13, 4294967168  ;;  %v168_v0 = vld [vmem:[%s146_s15 + $0x4] sm:$0x3]  ;;  %v166_v1 = vld [vmem:[%s146_s15] sm:$0x3]  ;;  %vm299_vm0 = vcmask 1047556  }
  0x23   : > { %234 = vxpose.xlu1.b32.start.end [1/1] (short) (narrow) %v168_v0, 16  ;;  %170 = vxpose.xlu0.b32.start.end [1/1] (short) (narrow) %v166_v1, 16  ;;  %v169_v2 = vld [vmem:[%s146_s15 + $0x6] sm:$0x3]  ;;  %v167_v3 = vld [vmem:[%s146_s15 + $0x2] sm:$0x3] }
  0x24   : > { %v1516_v6 = vmov 1983009808   ;;  %v1517_v14 = vmov 1934713408   ;;  %s1518_s16 = smov 8   ;;  %s1519_s17 = smov 4  }
  0x25   : > { %v304_v7 = vunpack.c.l.s4 %v1516_v6  ;;  %v328_v15 = vunpack.c.l.s4 %v1517_v14  ;;  %s1520_s18 = smov 12   ;;  %s1521_s22 = smov 16   ;;  %vm1167_vm1 = vcmask 31744   ;;  %vm1169_vm2 = vcmask 64512  }
  0x26   : > { %s1522_s23 = smov 24   ;;  %s1523_s24 = smov 20   ;;  %vm1171_vm3 = vcmask 97280   ;;  %vm1173_vm4 = vcmask 130048   ;;  %vm1175_vm5 = vcmask 162816   ;;  %vm1177_vm6 = vcmask 195584  }
  0x27   : > { %v1625_v11 = vunpack.c.0.s8 %v304_v7  ;;  %v1633_v25 = vunpack.c.0.s8 %v328_v15  ;;  %s1524_s25 = smov 28   ;;  %s1525_s26 = smov 32   ;;  %vm1179_vm7 = vcmask 228352   ;;  %vm1181_vm8 = vcmask 261120  }
  0x28   : > { %s1526_s27 = smov 36   ;;  %s1527_s28 = smov 40   ;;  %vm1183_vm9 = vcmask 293888   ;;  %vm1185_vm10 = vcmask 326656   ;;  %vm1187_vm11 = vcmask 359424   ;;  %vm1189_vm12 = vcmask 392192  }
  0x29   : > { %s1528_s29 = smov 44   ;;  %s1529_s30 = smov 48   ;;  %vm1191_vm13 = vcmask 424960   ;;  %vm1193_vm14 = vcmask 457728   ;;  %vm1195_vm15 = vcmask 490496  }
  0x2a   : > { %s1530_s2 = smov 56   ;;  %s1531_s3 = smov 52  }
  0x2b   : > { %s1532_s4 = smov 60   ;;  %s1312_s12 = sshll.u32 %s1617_s5, 1 }
  0x2c   : > { %s1314_s13 = sshll.u32 %s1504_s9, 1  ;;  %s1200_s9 = scalar_lea.sflag [#allocation4], %s1617_s5 }
  0x33   : > { %266 = vxpose.xlu1.b32.start.end [1/1] (short) (narrow) %v169_v2, 16  ;;  %202 = vxpose.xlu0.b32.start.end [1/1] (short) (narrow) %v167_v3, 16 }
  0xc7   : > { %v250_v4 = vpop.trf.xlu1  ;;  %v186_v5 = vpop.trf.xlu0 }
  0xc8   : > { %v298_v10 = vrot.slane %v250_v4, 4  ;;  %v301_v12 = vrot.slane %v186_v5, 4 }
  0xca   : > { %v300_v13 = vsel %vm299_vm0, %v298_v10, %v186_v5  ;;  %v302_v16 = vsel %vm299_vm0, %v250_v4, %v301_v12 }
  0xcb   : > { %v306_v17 = vperm.slane %v300_v13, %v1625_v11  ;;  %v310_v24 = vperm.slane %v302_v16, %v1625_v11 }
  0xcd   : > { %v325_v26 = vrot.slane %v306_v17, 4  ;;  %v337_v33 = vrot.slane %v310_v24, 4 }
  0xcf   : > { %v251_v8 = vpop.trf.xlu1  ;;  %v187_v9 = vpop.trf.xlu0 }
  0xd0   : > { %v355_v32 = vrot.slane %v251_v8, 4  ;;  %v357_v35 = vrot.slane %v187_v9, 4 }
  0xd2   : > { %v356_v46 = vsel %vm299_vm0, %v355_v32, %v187_v9  ;;  %v358_v51 = vsel %vm299_vm0, %v251_v8, %v357_v35 }
  0xd3   : > { %v362_v52 = vperm.slane %v356_v46, %v1625_v11  ;;  %v366_v55 = vperm.slane %v358_v51, %v1625_v11 }
  0xd5   : > { %v393_v61 = vrot.slane %v366_v55, 4  ;;  %v381_v62 = vrot.slane %v362_v52, 4 }
  0xd7   : > { %v282_v18 = vpop.trf.xlu1  ;;  %v218_v19 = vpop.trf.xlu0 }
  0xd8   : > { %v311_v20 = vrot.slane %v282_v18, 4  ;;  %v313_v21 = vrot.slane %v218_v19, 4 }
  0xda   : > { %v312_v22 = vsel %vm299_vm0, %v311_v20, %v218_v19  ;;  %v314_v23 = vsel %vm299_vm0, %v282_v18, %v313_v21 }
  0xdb   : > { %v318_v27 = vperm.slane %v312_v22, %v1625_v11  ;;  %v322_v28 = vperm.slane %v314_v23, %v1625_v11 }
  0xdd   : > { %v323_v29 = vrot.slane %v318_v27, 4  ;;  %v335_v30 = vrot.slane %v322_v28, 4  ;;  %v326_v31 = vsel %vm299_vm0, %v318_v27, %v325_v26  ;;  %v338_v43 = vsel %vm299_vm0, %v322_v28, %v337_v33 }
  0xde   : > { %v334_v34 = vperm.slane %v326_v31, %v1633_v25  ;;  %v346_v50 = vperm.slane %v338_v43, %v1633_v25 }
  0xdf   : > { %v283_v36 = vpop.trf.xlu1  ;;  %v219_v37 = vpop.trf.xlu0  ;;  %v336_v38 = vsel %vm299_vm0, %v335_v30, %v310_v24  ;;  %v324_v39 = vsel %vm299_vm0, %v323_v29, %v306_v17 }
  0xe0   : > { %v367_v40 = vrot.slane %v283_v36, 4  ;;  %v342_v41 = vperm.slane %v336_v38, %v1633_v25  ;;  %v330_v42 = vperm.slane %v324_v39, %v1633_v25  ;;  %v369_v44 = vrot.slane %v219_v37, 4 }
  0xe1   : > { %v349_v45 = vrot.slane %v334_v34, 4  ;;  %v353_v57 = vrot.slane %v346_v50, 4 }
  0xe2   : > { %v368_v47 = vsel %vm299_vm0, %v367_v40, %v219_v37  ;;  %539 = vxpose.xlu1.b32.start.end [1/1] (short) (narrow) %v342_v41, 8  ;;  %411 = vxpose.xlu2.b32.start.end [1/1] (short) (narrow) %v330_v42, 8  ;;  %v370_v53 = vsel %vm299_vm0, %v283_v36, %v369_v44  ;;  %v347_v6 = vrot.slane %v330_v42, 4  ;;  %v351_v13 = vrot.slane %v342_v41, 4 }
  0xe3   : > { %v374_v48 = vperm.slane %v368_v47, %v1625_v11  ;;  %v350_v49 = vsel %vm299_vm0, 0.0, %v349_v45  ;;  %v378_v59 = vperm.slane %v370_v53, %v1625_v11  ;;  %v354_v60 = vsel %vm299_vm0, 0.0, %v353_v57 }
  0xe4   : > { %507 = vxpose.xlu0.b32.start.end [1/1] (short) (narrow) %v350_v49, 8  ;;  %v348_v9 = vsel %vm299_vm0, 0.0, %v347_v6  ;;  %v352_v14 = vsel %vm299_vm0, 0.0, %v351_v13 }
  0xe5   : > { %v379_v54 = vrot.slane %v374_v48, 4  ;;  %v391_v63 = vrot.slane %v378_v59, 4  ;;  %v394_v0 = vsel %vm299_vm0, %v378_v59, %v393_v61  ;;  %v382_v1 = vsel %vm299_vm0, %v374_v48, %v381_v62 }
  0xe6   : > { %v402_v2 = vperm.slane %v394_v0, %v1633_v25  ;;  %v390_v4 = vperm.slane %v382_v1, %v1633_v25 }
  0xe7   : > { %v380_v56 = vsel %vm299_vm0, %v379_v54, %v362_v52  ;;  %v392_v3 = vsel %vm299_vm0, %v391_v63, %v366_v55 }
  0xe8   : > { %v386_v58 = vperm.slane %v380_v56, %v1633_v25  ;;  %v398_v5 = vperm.slane %v392_v3, %v1633_v25  ;;  %v405_v7 = vrot.slane %v390_v4, 4  ;;  %v409_v17 = vrot.slane %v402_v2, 4 }
  0xea   : > { %475 = vxpose.xlu2.b32.start.end [1/1] (short) (narrow) %v334_v34, 8  ;;  %667 = vxpose.xlu1.b32.start.end [1/1] (short) (narrow) %v386_v58, 8  ;;  %v407_v8 = vrot.slane %v398_v5, 4  ;;  %v406_v10 = vsel %vm299_vm0, 0.0, %v405_v7  ;;  %v403_v15 = vrot.slane %v386_v58, 4  ;;  %v410_v18 = vsel %vm299_vm0, 0.0, %v409_v17 }
  0xec   : > { %635 = vxpose.xlu0.b32.start.end [1/1] (short) (narrow) %v354_v60, 8  ;;  %v408_v12 = vsel %vm299_vm0, 0.0, %v407_v8  ;;  %v404_v16 = vsel %vm299_vm0, 0.0, %v403_v15 }
  0xf2   : > { %603 = vxpose.xlu2.b32.start.end [1/1] (short) (narrow) %v346_v50, 8  ;;  %859 = vxpose.xlu1.b32.start.end [1/1] (short) (narrow) %v402_v2, 8 }
  0xf4   : > { %731 = vxpose.xlu0.b32.start.end [1/1] (short) (narrow) %v390_v4, 8 }
  0xfa   : > { %443 = vxpose.xlu2.b32.start.end [1/1] (short) (narrow) %v348_v9, 8  ;;  %763 = vxpose.xlu1.b32.start.end [1/1] (short) (narrow) %v406_v10, 8 }
  0xfc   : > { %827 = vxpose.xlu0.b32.start.end [1/1] (short) (narrow) %v408_v12, 8 }
 0x102   : > { %571 = vxpose.xlu2.b32.start.end [1/1] (short) (narrow) %v352_v14, 8 }
 0x10a   : > { %795 = vxpose.xlu2.b32.start.end [1/1] (short) (narrow) %v398_v5, 8 }
 0x112   : > { %699 = vxpose.xlu2.b32.start.end [1/1] (short) (narrow) %v404_v16, 8 }
 0x11a   : > { %891 = vxpose.xlu2.b32.start.end [1/1] (short) (narrow) %v410_v18, 8 }
 0x17b   : > { %v427_v19 = vpop.trf.xlu2 }
 0x183   : > { %v491_v20 = vpop.trf.xlu2 }
 0x184   : > { %v923_v27 = vrot.slane %v491_v20, 4 }
 0x186   : > { %v555_v21 = vpop.trf.xlu1  ;;  %v924_v32 = vsel %vm299_vm0, %v923_v27, %v427_v19 }
 0x187   : > { %v928_v36 = vperm.slane %v924_v32, %v1625_v11 }
 0x188   : > { %v523_v23 = vpop.trf.xlu0 }
 0x189   : > { %v929_v24 = vrot.slane %v523_v23, 4 }
 0x18b   : > { %v619_v22 = vpop.trf.xlu2 }
 0x18c   : > { %v935_v34 = vrot.slane %v619_v22, 4 }
 0x18e   : > { %v683_v26 = vpop.trf.xlu1  ;;  %v936_v40 = vsel %vm299_vm0, %v935_v34, %v555_v21 }
 0x18f   : > { %v940_v44 = vperm.slane %v936_v40, %v1625_v11 }
 0x190   : > { %v651_v31 = vpop.trf.xlu0 }
 0x191   : > { %v941_v35 = vrot.slane %v651_v31, 4 }
 0x193   : > { %v459_v28 = vpop.trf.xlu2 }
 0x194   : > { %v930_v29 = vsel %vm299_vm0, %v929_v24, %v459_v28 }
 0x195   : > { %v934_v30 = vperm.slane %v930_v29, %v1625_v11 }
 0x196   : > { %v875_v39 = vpop.trf.xlu1 }
 0x197   : > { %v947_v33 = vrot.slane %v934_v30, 4  ;;  %v975_v20 = vrot.slane %v875_v39, 4 }
 0x198   : > { %v747_v60 = vpop.trf.xlu0 }
 0x199   : > { %v948_v37 = vsel %vm299_vm0, %v947_v33, %v928_v36  ;;  %v963_v3 = vrot.slane %v747_v60, 4 }
 0x19a   : > { %v952_v43 = vperm.slane %v948_v37, %v1633_v25 }
 0x19b   : > { %v587_v38 = vpop.trf.xlu2  ;;  %v964_v15 = vsel %vm299_vm0, %v963_v3, %v683_v26 }
 0x19c   : > { %v942_v41 = vsel %vm299_vm0, %v941_v35, %v587_v38  ;;  %v961_v47 = vrot.slane %v952_v43, 4  ;;  %v968_v21 = vperm.slane %v964_v15, %v1625_v11 }
 0x19d   : > { %v946_v42 = vperm.slane %v942_v41, %v1625_v11 }
 0x19e   : > { %v779_v52 = vpop.trf.xlu1 }
 0x19f   : > { %v953_v45 = vrot.slane %v946_v42, 4  ;;  %v969_v61 = vrot.slane %v779_v52, 4 }
 0x1a0   : > { %v843_v23 = vpop.trf.xlu0 }
 0x1a1   : > { %v954_v46 = vsel %vm299_vm0, %v953_v45, %v940_v44 }
 0x1a2   : > { %v958_v48 = vperm.slane %v954_v46, %v1633_v25 }
 0x1a3   : > { %v811_v49 = vpop.trf.xlu2 }
 0x1a4   : > { %v959_v50 = vrot.slane %v958_v48, 4  ;;  %v962_v51 = vsel %vm299_vm0, %v958_v48, %v961_v47  ;;  %v976_v29 = vsel %vm299_vm0, %v975_v20, %v811_v49 }
 0x1a5   : > { %v1013_v53 = vrot.slane %v962_v51, 4  ;;  %v1018_v54 = vperm.slane %v962_v51, %v1625_v11  ;;  %v980_v34 = vperm.slane %v976_v29, %v1625_v11 }
 0x1a6   : > { %v960_v55 = vsel %vm299_vm0, %v959_v50, %v952_v43 }
 0x1a7   : > { %v1008_v56 = vperm.slane %v960_v55, %v1625_v11  ;;  %v1023_v57 = vrot.slane %v1018_v54, 4  ;;  %v1003_v58 = vrot.slane %v960_v55, 4  ;;  %v1014_v59 = vsel %vm299_vm0, 0.0, %v1013_v53 }
 0x1a8   : > { %v1022_v1 = vperm.slane %v1014_v59, %v1625_v11 }
 0x1a9   : > { %v1025_v62 = vrot.slane %v1008_v56, 4  ;;  %v1024_v63 = vsel %vm299_vm0, %v1023_v57, %v1008_v56  ;;  %v1004_v0 = vsel %vm299_vm0, 0.0, %v1003_v58 }
 0x1aa   : > { %v1690_v2 = vperm.slane %v1024_v63, %v1633_v25  ;;  %v1012_v9 = vperm.slane %v1004_v0, %v1625_v11  ;;  %v1035_v12 = vrot.slane %v1022_v1, 4 }
 0x1ab   : > { %v715_v4 = vpop.trf.xlu2  ;;  %v1026_v5 = vsel %vm299_vm0, %v1018_v54, %v1025_v62 }
 0x1ac   : > { %v970_v6 = vsel %vm299_vm0, %v969_v61, %v715_v4  ;;  %v1034_v7 = vperm.slane %v1026_v5, %v1633_v25  ;;  %v1047_v8 = vrot.slane %v1690_v2, 4  ;;  %v1037_v17 = vrot.slane %v1012_v9, 4 }
 0x1ad   : > { %v974_v10 = vperm.slane %v970_v6, %v1625_v11  ;;  %v1036_v19 = vsel %vm299_vm0, %v1035_v12, %v1012_v9 }
 0x1ae   : > { %1112 = vrot.lane.b32.xlu1 %v1034_v7, %s1518_s16  ;;  %v1048_v13 = vsel %vm299_vm0, 0.0, %v1047_v8  ;;  %v1049_v14 = vrot.slane %v1034_v7, 4  ;;  %v1042_v27 = vperm.slane %v1036_v19, %v1633_v25  ;;  %v1038_v28 = vsel %vm299_vm0, %v1022_v1, %v1037_v17 }
 0x1af   : > { %1108 = vrot.lane.b32.xlu0 %v1048_v13, %s1519_s17  ;;  %v987_v18 = vrot.slane %v974_v10, 4  ;;  %v1046_v32 = vperm.slane %v1038_v28, %v1633_v25  ;;  %s1212_s17 = scalar_lea.hbm %s1777_s1, %s1314_s13 }
 0x1b0   : > { %v1050_v16 = vsel %vm299_vm0, 0.0, %v1049_v14  ;;  %v1051_v36 = vrot.slane %v1042_v27, 4 }
 0x1b1   : > { %1116 = vrot.lane.b32.xlu2 %v1050_v16, %s1520_s18  ;;  %v988_v26 = vsel %vm299_vm0, %v987_v18, %v968_v21  ;;  %v1053_v45 = vrot.slane %v1046_v32, 4  ;;  %s165_s18 = scalar_lea.vmem [#allocation5], %s1312_s12 }
 0x1b2   : > { %v992_v33 = vperm.slane %v988_v26, %v1633_v25  ;;  %v1052_v40 = vsel %vm299_vm0, 0.0, %v1051_v36 }
 0x1b3   : > { %v907_v22 = vpop.trf.xlu2  ;;  %v1054_v56 = vsel %vm299_vm0, 0.0, %v1053_v45 }
 0x1b4   : > { %v981_v24 = vrot.slane %v907_v22, 4  ;;  %v1001_v38 = vrot.slane %v992_v33, 4 }
 0x1b6   : > { %v982_v30 = vsel %vm299_vm0, %v981_v24, %v843_v23  ;;  %1120 = vrot.lane.b32.xlu1 %v1042_v27, %s1521_s22  ;;  %s1214_s22 = sshll.u32 %s165_s18, 4  ;;  %s1215_s22 = int_to_ptr.vmem [resolvable:$true] %s1214_s22 }
 0x1b7   : > { %v986_v31 = vperm.slane %v982_v30, %v1625_v11 }
 0x1b9   : > { %v993_v35 = vrot.slane %v986_v31, 4  ;;  %1128 = vrot.lane.b32.xlu2 %v1046_v32, %s1522_s23  ;;  %s1216_s23 = sshll.u32 %s1212_s17, 4  ;;  %s1217_s23 = int_to_ptr.hbm [resolvable:$true] %s1216_s23 }
 0x1bb   : > { %v994_v37 = vsel %vm299_vm0, %v993_v35, %v980_v34 }
 0x1bc   : > { %v998_v39 = vperm.slane %v994_v37, %v1633_v25 }
 0x1be   : > { %v999_v41 = vrot.slane %v998_v39, 4  ;;  %1124 = vrot.lane.b32.xlu1 %v1052_v40, %s1523_s24  ;;  %v1002_v42 = vsel %vm299_vm0, %v998_v39, %v1001_v38  ;;  %s1444_s24 = sshra.s32 %s1217_s23, 4  ;;  %s1445_s24 = int_to_ptr.hbm [resolvable:$true] %s1444_s24 }
 0x1bf   : > { %v1065_v43 = vrot.slane %v1002_v42, 4  ;;  %v1070_v44 = vperm.slane %v1002_v42, %v1625_v11  ;;  %p1451_p7 = scmp.lt.s32.totalorder %s1445_s24, %s1777_s1 }
 0x1c0   : > { %v1000_v46 = vsel %vm299_vm0, %v999_v41, %v992_v33 }
 0x1c1   : > { %v1060_v47 = vperm.slane %v1000_v46, %v1625_v11  ;;  %v1075_v48 = vrot.slane %v1070_v44, 4  ;;  %v1055_v49 = vrot.slane %v1000_v46, 4  ;;  %v1066_v50 = vsel %vm299_vm0, 0.0, %v1065_v43 }
 0x1c2   : > { %v1074_v51 = vperm.slane %v1066_v50, %v1625_v11 }
 0x1c3   : > { %v1076_v52 = vsel %vm299_vm0, %v1075_v48, %v1060_v47  ;;  %v1077_v53 = vrot.slane %v1060_v47, 4  ;;  %v1056_v54 = vsel %vm299_vm0, 0.0, %v1055_v49 }
 0x1c4   : > { %v1082_v55 = vperm.slane %v1076_v52, %v1633_v25  ;;  %v1064_v58 = vperm.slane %v1056_v54, %v1625_v11  ;;  %v1087_v61 = vrot.slane %v1074_v51, 4 }
 0x1c5   : > { %v1078_v57 = vsel %vm299_vm0, %v1070_v44, %v1077_v53 }
 0x1c6   : > { %1132 = vrot.lane.b32.xlu1 %v1054_v56, %s1524_s25  ;;  %1136 = vrot.lane.b32.xlu0 %v1082_v55, %s1525_s26  ;;  %v1099_v59 = vrot.slane %v1082_v55, 4  ;;  %v1086_v60 = vperm.slane %v1078_v57, %v1633_v25  ;;  %v1089_v0 = vrot.slane %v1064_v58, 4  ;;  %v1088_v1 = vsel %vm299_vm0, %v1087_v61, %v1064_v58  ;;  %s1446_s25 = scalar_lea.hbm %s1445_s24, 2 }
 0x1c7   : > { %v1094_v11 = vperm.slane %v1088_v1, %v1633_v25  ;;  %p1447_p4 = scmp.ne.s32.totalorder %s1445_s24, %s1446_s25 }
 0x1c8   : > { %v1100_v62 = vsel %vm299_vm0, 0.0, %v1099_v59  ;;  %v1101_v63 = vrot.slane %v1086_v60, 4  ;;  %v1090_v4 = vsel %vm299_vm0, %v1074_v51, %v1089_v0 }
 0x1c9   : > { %1140 = vrot.lane.b32.xlu2 %v1100_v62, %s1526_s27  ;;  %v1098_v5 = vperm.slane %v1090_v4, %v1633_v25  ;;  %v1103_v6 = vrot.slane %v1094_v11, 4  ;;  %p1448_p5 = pnand %p1447_p4, %p1594_p9 }
 0x1ca   : > { %v1102_v3 = vsel %vm299_vm0, 0.0, %v1101_v63 }
 0x1cb   : > { %v1105_v7 = vrot.slane %v1098_v5, 4  ;;  %v1104_v8 = vsel %vm299_vm0, 0.0, %v1103_v6  ;;  %p1449_p6 = pneg %p1448_p5 }
 0x1cd   : > { %v1106_v9 = vsel %vm299_vm0, 0.0, %v1105_v7  ;;  %vm1197_vm0 = vcmask 517120  }
 0x1ce   : > { %1144 = vrot.lane.b32.xlu1 %v1086_v60, %s1527_s28  ;;  %1148 = vrot.lane.b32.xlu0 %v1102_v3, %s1528_s29  ;;  %s1450_s28 = scalar_lea.hbm %s1777_s1, 4 }
 0x1cf   : > { %p1452_p8 = scmp.lt.s32.totalorder %s1450_s28, %s1446_s25 }
 0x1d1   : > { %1152 = vrot.lane.b32.xlu2 %v1094_v11, %s1529_s30  ;;  %p1453_p10 = por %p1452_p8, %p1451_p7 }
 0x1d3   : > { %p1454_p13 = pnand %p1453_p10, %p1449_p6 }
 0x1d6   : > { %1160 = vrot.lane.b32.xlu0 %v1098_v5, %s1530_s2  ;;  %1156 = vrot.lane.b32.xlu1 %v1104_v8, %s1531_s3 }
 0x1d9   : > { %1164 = vrot.lane.b32.xlu2 %v1106_v9, %s1532_s4 }
 0x20b   : > { %v1117_v12 = vpop.permute.xlu2 %1116 }
 0x213   : > { %v1129_v25 = vpop.permute.xlu2 %1128 }
 0x220   : > { %v1113_v10 = vpop.permute.xlu1 %1112 }
 0x221   : > { %v1109_v14 = vpop.permute.xlu0 %1108 }
 0x222   : > { %v1168_v15 = vsel %vm1167_vm1, %v1690_v2, %v1109_v14 }
 0x223   : > { %v1170_v17 = vsel %vm1169_vm2, %v1168_v15, %v1113_v10  ;;  %v1141_v18 = vpop.permute.xlu2 %1140 }
 0x224   : > { %v1172_v19 = vsel %vm1171_vm3, %v1170_v17, %v1117_v12 }
 0x228   : > { %v1121_v13 = vpop.permute.xlu1 %1120 }
 0x229   : > { %v1174_v20 = vsel %vm1173_vm4, %v1172_v19, %v1121_v13 }
 0x22b   : > { %v1153_v2 = vpop.permute.xlu2 %1152 }
 0x230   : > { %v1125_v16 = vpop.permute.xlu1 %1124 }
 0x231   : > { %v1176_v21 = vsel %vm1175_vm5, %v1174_v20, %v1125_v16 }
 0x232   : > { %v1178_v24 = vsel %vm1177_vm6, %v1176_v21, %v1129_v25 }
 0x233   : > { %v1165_v37 = vpop.permute.xlu2 %1164 }
 0x238   : > { %v1133_v22 = vpop.permute.xlu1 %1132  ;;  %v1137_v23 = vpop.permute.xlu0 %1136 }
 0x239   : > { %v1180_v27 = vsel %vm1179_vm7, %v1178_v24, %v1133_v22 }
 0x23a   : > { %v1182_v28 = vsel %vm1181_vm8, %v1180_v27, %v1137_v23 }
 0x23b   : > { %v1184_v30 = vsel %vm1183_vm9, %v1182_v28, %v1141_v18 }
 0x240   : > { %v1145_v26 = vpop.permute.xlu1 %1144  ;;  %v1149_v29 = vpop.permute.xlu0 %1148 }
 0x241   : > { %v1186_v31 = vsel %vm1185_vm10, %v1184_v30, %v1145_v26 }
 0x242   : > { %v1188_v32 = vsel %vm1187_vm11, %v1186_v31, %v1149_v29 }
 0x243   : > { %v1190_v34 = vsel %vm1189_vm12, %v1188_v32, %v1153_v2 }
 0x248   : > { %v1157_v33 = vpop.permute.xlu1 %1156  ;;  %v1161_v35 = vpop.permute.xlu0 %1160 }
 0x249   : > { %v1192_v36 = vsel %vm1191_vm13, %v1190_v34, %v1157_v33 }
 0x24a   : > { %v1194_v38 = vsel %vm1193_vm14, %v1192_v36, %v1161_v35 }
 0x24b   : > { %v1196_v39 = vsel %vm1195_vm15, %v1194_v38, %v1165_v37 }
 0x24c   : > { %1198 = vst.msk [vmem:[%s165_s18] sm:$0x3] %vm1197_vm0, %v1196_v39 }
 0x24d   : > { %1457 = shalt.err (!%p1454_p13)
}
 0x24e   : > { %1320 = dma.vmem_to_hbm [thread:$0]  (%p1594_p9), %s1215_s22, 32, %s1217_s23, %s1200_s9  }
 0x24f PF: > { %s1228_s5 = sand.u32 1, %s1492_s6   ;;  %p1327_p0 = pnand %p1306_p12, %p1601_p11 }
 0x250   : > { %s1229_s2 = scalar_lea.sflag [#allocation4], %s1228_s5 }
 0x251   : > { %p1328_p1 = pneg %p1327_p0 }
 0x253   : > { %1487 = dma.done.wait (%p1328_p1), %s1229_s2, 32  }
 0x254   : > { %1489 = vsyncadd (%p1328_p1), %s1229_s2, 4294967264  ;;  %s17_s11 = sadd.s32 1, %s1512_s11   ;;  %s1782_s6 = smov %s1496_s7 }
 0x255   : > { %p14_p2 = scmp.ge.s32.totalorder %s17_s11, 4   ;;  %s1783_s7 = smov %s1500_s8 }
 0x256   : > { %s1784_s8 = smov %s1599_s20  ;;  %s1785_s9 = smov %s1508_s10 }
 0x257   : > { %s1786_s10 = smov %s1788_s14  ;;  %16 = sbr.rel (!%p14_p2) target bundleno = 6 (0x6), region = 69 }
 0x25c   :  { %1235 = vsyncpa [#allocation3], 1 }
 0x25d   :  { %1237 = vsyncpa [#allocation3 + $0x1], 1 }
 0x25e   :  { %1238 = vsyncpa [#allocation4], 1 }
 0x25f   :  { %1240 = vsyncpa [#allocation4 + $0x1], 1 }

</bundles_post_ra>
